<compile_context>
chip_gen: v7x
topology: tpu7x:2x2x1
jax: 0.10.0
libtpu: 0.0.40
codegen_flags: <defaults>
</compile_context>

<pallas_src>
import math
from functools import partial

import jax
import jax.numpy as jnp
from jax.experimental import pallas as pl
from jax.experimental.pallas import tpu as pltpu


def _flash_mha_kernel(q_ref, k_ref, v_ref, mask_ref, wo_ref, o_ref,
                      m_sc, l_sc, acc_sc, *, num_heads: int, d_k: int):
    """One (batch, query-tile, kv-tile) grid step.

    q_ref   : (1, H, TQ,  d_k) bf16  projected + pre-scaled query tile (heads-major)
    k_ref   : (1, H, TKV, d_k) bf16  projected key tile
    v_ref   : (1, H, TKV, d_k) bf16  projected value tile
    mask_ref: (1, TQ, TKV)     int8  raw mask tile (nonzero = keep)
    wo_ref  : (H, d_k, D)      bf16  output projection, per-head reshaped
    o_ref   : (1, TQ, D)       out dtype
    m_sc    : (H, TQ, 1)   f32  running row max
    l_sc    : (H, TQ, 1)   f32  running softmax denominator
    acc_sc  : (H, TQ, d_k) f32  running numerator
    """
    kt = pl.program_id(2)

    @pl.when(kt == 0)
    def _():
        m_sc[...] = jnp.full(m_sc.shape, -jnp.inf, m_sc.dtype)
        l_sc[...] = jnp.zeros(l_sc.shape, l_sc.dtype)
        acc_sc[...] = jnp.zeros(acc_sc.shape, acc_sc.dtype)

    q = q_ref[0]                                   # (H, TQ,  dk) bf16
    k = k_ref[0]                                   # (H, TKV, dk) bf16
    v = v_ref[0]                                   # (H, TKV, dk) bf16

    # Head-batched QK^T with f32 accumulation (scale already folded into Q).
    s = jnp.einsum('hqd,hkd->hqk', q, k,
                   preferred_element_type=jnp.float32)      # (H, TQ, TKV)

    # In-kernel masked_fill(mask == 0, -1e9); mask broadcasts over heads.
    mvals = mask_ref[0].astype(jnp.float32)                 # (TQ, TKV)
    s = jnp.where(mvals[None, :, :] == 0.0, jnp.float32(-1e9), s)

    # Online (flash) softmax update in f32.
    m_prev = m_sc[...]
    m_new = jnp.maximum(m_prev, s.max(axis=-1, keepdims=True))
    alpha = jnp.exp(m_prev - m_new)
    p = jnp.exp(s - m_new)
    l_sc[...] = alpha * l_sc[...] + p.sum(axis=-1, keepdims=True)
    acc_sc[...] = alpha * acc_sc[...] + jnp.einsum(
        'hqk,hkd->hqd', p.astype(jnp.bfloat16), v,
        preferred_element_type=jnp.float32)
    m_sc[...] = m_new

    # Finalize at the last KV tile: normalize and fuse the output projection
    # as out = sum_h ctx_h @ wo_h (no context transpose, lane-dense D output).
    @pl.when(kt == pl.num_programs(2) - 1)
    def _():
        inv_l = pl.reciprocal(l_sc[...], approx=True)        # (H, TQ, 1), EUP
        tq = o_ref.shape[1]
        d_model = num_heads * d_k
        out = jnp.zeros((tq, d_model), jnp.float32)
        # Only (TQ, d_k)-sized values are live per iteration here; the heavy
        # (TQ, TKV) work above is head-batched, not a per-head Python loop.
        for h in range(num_heads):
            ctx_h = (acc_sc[h] * inv_l[h]).astype(jnp.bfloat16)   # (TQ, dk)
            out = out + jnp.dot(ctx_h, wo_ref[h],
                                preferred_element_type=jnp.float32)
        o_ref[0] = out.astype(o_ref.dtype)


def _round_up(x: int, m: int) -> int:
    return (x + m - 1) // m * m


def _pick_tiles(S: int):
    """Return (S_pad, TQ, TKV).  Never falls back to a full-sequence tile."""
    if S <= 256:
        return S, S, S           # blocks equal full dims → always legal
    TQ = 256
    TKV = 512 if S > 512 else 256
    return _round_up(S, TKV), TQ, TKV


def multi_head_attention(q, k, v, mask, wq, wk, wv, wo, num_heads: int, *,
                         out_dtype=jnp.bfloat16):
    """q,k,v: (B, S, D) f32; mask: (B, S, S) (nonzero=keep); w*: (D, D) PyTorch
    nn.Linear weights (out, in). Returns (B, S, D) in `out_dtype`."""
    B, S, D = q.shape
    assert D % num_heads == 0
    d_k = D // num_heads
    S_pad, TQ, TKV = _pick_tiles(S)
    nq, nkv = S_pad // TQ, S_pad // TKV

    scale = 1.0 / math.sqrt(d_k)

    # Hoisted projections (nn.Linear: y = x @ W.T): MXU-optimal XLA GEMMs with
    # bf16 operands / f32 accumulation.  Softmax scale folded into Q.
    def proj(x, w):
        return jnp.einsum('bsd,de->bse', x.astype(jnp.bfloat16),
                          w.T.astype(jnp.bfloat16),
                          preferred_element_type=jnp.float32)

    qp = proj(q, wq) * scale
    kp = proj(k, wk)
    vp = proj(v, wv)

    # Heads-major (B, H, S, d_k), bf16, padded along S if needed.
    def to_heads(x):
        x = x.reshape(B, S, num_heads, d_k).transpose(0, 2, 1, 3)
        if S_pad != S:
            x = jnp.pad(x, ((0, 0), (0, 0), (0, S_pad - S), (0, 0)))
        return x.astype(jnp.bfloat16)

    qh, kh, vh = to_heads(qp), to_heads(kp), to_heads(vp)

    # Raw mask as int8 (1 byte/elem stream); padded key columns are masked out.
    mask_i8 = (mask != 0).astype(jnp.int8)
    if S_pad != S:
        mask_i8 = jnp.pad(mask_i8, ((0, 0), (0, S_pad - S), (0, S_pad - S)))

    # W_o reshaped per head so the kernel needs no context transpose.
    wo_h = wo.T.reshape(num_heads, d_k, D).astype(jnp.bfloat16)

    kernel = partial(_flash_mha_kernel, num_heads=num_heads, d_k=d_k)

    q_spec = pl.BlockSpec((1, num_heads, TQ, d_k), lambda b, qt, kt: (b, 0, qt, 0))
    kv_spec = pl.BlockSpec((1, num_heads, TKV, d_k), lambda b, qt, kt: (b, 0, kt, 0))
    mask_spec = pl.BlockSpec((1, TQ, TKV), lambda b, qt, kt: (b, qt, kt))
    # Constant block index → fetched once and kept resident (small: H*d_k*D bf16).
    wo_spec = pl.BlockSpec((num_heads, d_k, D), lambda b, qt, kt: (0, 0, 0))
    out_spec = pl.BlockSpec((1, TQ, D), lambda b, qt, kt: (b, qt, 0))

    out = pl.pallas_call(
        kernel,
        out_shape=jax.ShapeDtypeStruct((B, S_pad, D), out_dtype),
        grid_spec=pltpu.PrefetchScalarGridSpec(
            num_scalar_prefetch=0,
            grid=(B, nq, nkv),
            in_specs=[q_spec, kv_spec, kv_spec, mask_spec, wo_spec],
            out_specs=out_spec,
            scratch_shapes=[
                pltpu.VMEM((num_heads, TQ, 1), jnp.float32),    # running max
                pltpu.VMEM((num_heads, TQ, 1), jnp.float32),    # running denom
                pltpu.VMEM((num_heads, TQ, d_k), jnp.float32),  # running numer
            ],
        ),
        compiler_params=pltpu.CompilerParams(
            # batch and query-tile axes fully parallel (v7x dual-TC sharding);
            # only the KV reduction axis is sequential.
            dimension_semantics=("parallel", "parallel", "arbitrary"),
            vmem_limit_bytes=40 * 1024 * 1024,
        ),
    )(qh, kh, vh, mask_i8, wo_h)

    if S_pad != S:
        out = out[:, :S, :]
    return out


def _reference(q, k, v, mask, wq, wk, wv, wo, num_heads):
    """Pure-JAX f32 reference mirroring the PyTorch module (eval mode)."""
    B, S, D = q.shape
    d_k = D // num_heads
    qp = q @ wq.T
    kp = k @ wk.T
    vp = v @ wv.T

    def split(x):  # (B, S, D) -> (B, h, S, d_k)
        return x.reshape(B, S, num_heads, d_k).transpose(0, 2, 1, 3)

    qh, kh, vh = split(qp), split(kp), split(vp)
    scores = jnp.einsum('bhqd,bhkd->bhqk', qh, kh) / math.sqrt(d_k)
    scores = jnp.where(mask[:, None, :, :] == 0, -1e9, scores)
    probs = jax.nn.softmax(scores, axis=-1)
    out = jnp.einsum('bhqk,bhkd->bhqd', probs, vh)
    out = out.transpose(0, 2, 1, 3).reshape(B, S, D)
    return out @ wo.T


if __name__ == "__main__":
    B, S, D, H = 2, 8, 32, 4   # batch, seq, d_model, heads  (d_k = 8)

    key = jax.random.PRNGKey(0)
    kq, kk, kv, kwq, kwk, kwv, kwo, kmask = jax.random.split(key, 8)

    q = jax.random.normal(kq, (B, S, D), dtype=jnp.float32)
    k = jax.random.normal(kk, (B, S, D), dtype=jnp.float32)
    v = jax.random.normal(kv, (B, S, D), dtype=jnp.float32)

    # Deterministic "Linear(d_model, d_model, bias=False)" weights (PyTorch layout: (out, in)).
    bound = 1.0 / math.sqrt(D)
    wq = jax.random.uniform(kwq, (D, D), jnp.float32, -bound, bound)
    wk = jax.random.uniform(kwk, (D, D), jnp.float32, -bound, bound)
    wv = jax.random.uniform(kwv, (D, D), jnp.float32, -bound, bound)
    wo = jax.random.uniform(kwo, (D, D), jnp.float32, -bound, bound)

    # Causal-style mask broadcast over heads: 1 = keep, 0 = masked.
    mask = jnp.tril(jnp.ones((S, S), jnp.float32))[None].repeat(B, axis=0)

    out = multi_head_attention(q, k, v, mask, wq, wk, wv, wo, num_heads=H)
    out = jax.block_until_ready(out)

    ref = _reference(q, k, v, mask, wq, wk, wv, wo, num_heads=H)
    assert out.shape == (B, S, D)
    # bf16 GEMM operands + bf16 output + approx reciprocal → relaxed tolerance.
    assert jnp.allclose(out.astype(jnp.float32), ref, atol=4e-2, rtol=4e-2), \
        "mismatch vs reference"

    print("KERNEL_OK")
</pallas_src>

<mosaic_0001>
module attributes {stable_mosaic.version = 11 : i64} {
  func.func @_flash_mha_kernel(%arg0: i32, %arg1: i32, %arg2: i32, %arg3: memref<1x4x8x8xbf16, #tpu.memory_space<vmem>>, %arg4: memref<1x4x8x8xbf16, #tpu.memory_space<vmem>>, %arg5: memref<1x4x8x8xbf16, #tpu.memory_space<vmem>>, %arg6: memref<1x8x8xi8, #tpu.memory_space<vmem>>, %arg7: memref<4x8x32xbf16, #tpu.memory_space<vmem>>, %arg8: memref<1x8x32xbf16, #tpu.memory_space<vmem>>, %arg9: memref<4x8x1xf32, #tpu.memory_space<vmem>>, %arg10: memref<4x8x1xf32, #tpu.memory_space<vmem>>, %arg11: memref<4x8x8xf32, #tpu.memory_space<vmem>>) attributes {dimension_semantics = [#tpu.dimension_semantics<parallel>, #tpu.dimension_semantics<parallel>, #tpu.dimension_semantics<arbitrary>], iteration_bounds = array<i64: 2, 1, 1>, scalar_prefetch = 0 : i64, scratch_operands = 3 : i64, tpu.core_type = #tpu.core_type<tc>, window_params = [{transform_indices = @transform_0, window_bounds = array<i64: 1, 4, 8, 8>}, {transform_indices = @transform_1, window_bounds = array<i64: 1, 4, 8, 8>}, {transform_indices = @transform_2, window_bounds = array<i64: 1, 4, 8, 8>}, {transform_indices = @transform_3, window_bounds = array<i64: 1, 8, 8>}, {pipeline_mode = #tpu.pipeline_mode<synchronous>, transform_indices = @transform_4, window_bounds = array<i64: 4, 8, 32>}, {transform_indices = @transform_5, window_bounds = array<i64: 1, 8, 32>}]} {
    %c0_i32 = arith.constant 0 : i32
    %0 = arith.cmpi eq, %arg2, %c0_i32 : i32
    %1 = arith.extui %0 : i1 to i32
    %c0_i32_0 = arith.constant 0 : i32
    %2 = arith.cmpi ne, %1, %c0_i32_0 : i32
    scf.if %2 {
      %cst_40 = arith.constant 0xFF800000 : f32
      %46 = vector.broadcast %cst_40 : f32 to vector<4x8x1xf32>
      %c0_41 = arith.constant 0 : index
      %c0_42 = arith.constant 0 : index
      %c0_43 = arith.constant 0 : index
      %47 = vector.load %arg9[%c0_41, %c0_42, %c0_43] : memref<4x8x1xf32, #tpu.memory_space<vmem>>, vector<4x8x1xf32>
      tpu.vector_store %arg9[%c0_41, %c0_42, %c0_43], %46 {strides = array<i32>} : memref<4x8x1xf32, #tpu.memory_space<vmem>>, vector<4x8x1xf32>,
      %cst_44 = arith.constant 0.000000e+00 : f32
      %48 = vector.broadcast %cst_44 : f32 to vector<4x8x1xf32>
      %c0_45 = arith.constant 0 : index
      %c0_46 = arith.constant 0 : index
      %c0_47 = arith.constant 0 : index
      %49 = vector.load %arg10[%c0_45, %c0_46, %c0_47] : memref<4x8x1xf32, #tpu.memory_space<vmem>>, vector<4x8x1xf32>
      tpu.vector_store %arg10[%c0_45, %c0_46, %c0_47], %48 {strides = array<i32>} : memref<4x8x1xf32, #tpu.memory_space<vmem>>, vector<4x8x1xf32>,
      %cst_48 = arith.constant 0.000000e+00 : f32
      %50 = vector.broadcast %cst_48 : f32 to vector<4x8x8xf32>
      %c0_49 = arith.constant 0 : index
      %c0_50 = arith.constant 0 : index
      %c0_51 = arith.constant 0 : index
      %51 = vector.load %arg11[%c0_49, %c0_50, %c0_51] : memref<4x8x8xf32, #tpu.memory_space<vmem>>, vector<4x8x8xf32>
      tpu.vector_store %arg11[%c0_49, %c0_50, %c0_51], %50 {strides = array<i32>} : memref<4x8x8xf32, #tpu.memory_space<vmem>>, vector<4x8x8xf32>,
    } else {
    }
    %c0 = arith.constant 0 : index
    %c0_1 = arith.constant 0 : index
    %c0_2 = arith.constant 0 : index
    %c0_3 = arith.constant 0 : index
    %3 = vector.load %arg3[%c0, %c0_1, %c0_2, %c0_3] : memref<1x4x8x8xbf16, #tpu.memory_space<vmem>>, vector<1x4x8x8xbf16>
    %4 = vector.shape_cast %3 : vector<1x4x8x8xbf16> to vector<4x8x8xbf16>
    %c0_4 = arith.constant 0 : index
    %c0_5 = arith.constant 0 : index
    %c0_6 = arith.constant 0 : index
    %c0_7 = arith.constant 0 : index
    %5 = vector.load %arg4[%c0_4, %c0_5, %c0_6, %c0_7] : memref<1x4x8x8xbf16, #tpu.memory_space<vmem>>, vector<1x4x8x8xbf16>
    %6 = vector.shape_cast %5 : vector<1x4x8x8xbf16> to vector<4x8x8xbf16>
    %c0_8 = arith.constant 0 : index
    %c0_9 = arith.constant 0 : index
    %c0_10 = arith.constant 0 : index
    %c0_11 = arith.constant 0 : index
    %7 = vector.load %arg5[%c0_8, %c0_9, %c0_10, %c0_11] : memref<1x4x8x8xbf16, #tpu.memory_space<vmem>>, vector<1x4x8x8xbf16>
    %8 = vector.shape_cast %7 : vector<1x4x8x8xbf16> to vector<4x8x8xbf16>
    "tpu.trace_start"() <{level = 10 : i32, message = "hqd,hkd->hqk"}> : () -> ()
    %cst = arith.constant dense<0.000000e+00> : vector<4x8x8xf32>
    %9 = tpu.matmul %4, %6, %cst {dimension_numbers = #tpu.dot_dimension_numbers<[2], [2], [1], [1], [0, 0, 0, 1, 1, 1], [0], [0]>} : vector<4x8x8xbf16>, vector<4x8x8xbf16>, vector<4x8x8xf32> -> vector<4x8x8xf32>
    "tpu.trace_stop"() : () -> ()
    %c0_12 = arith.constant 0 : index
    %c0_13 = arith.constant 0 : index
    %c0_14 = arith.constant 0 : index
    %10 = vector.load %arg6[%c0_12, %c0_13, %c0_14] : memref<1x8x8xi8, #tpu.memory_space<vmem>>, vector<1x8x8xi8>
    %11 = vector.shape_cast %10 : vector<1x8x8xi8> to vector<8x8xi8>
    %12 = arith.sitofp %11 : vector<8x8xi8> to vector<8x8xf32>
    %13 = vector.shape_cast %12 : vector<8x8xf32> to vector<1x8x8xf32>
    %cst_15 = arith.constant 0.000000e+00 : f32
    %14 = vector.broadcast %cst_15 : f32 to vector<1x8x8xf32>
    %15 = arith.cmpf oeq, %13, %14 : vector<1x8x8xf32>
    %cst_16 = arith.constant -1.000000e+09 : f32
    %16 = vector.shape_cast %15 : vector<1x8x8xi1> to vector<1x8x8xi1>
    %17 = vector.broadcast %16 : vector<1x8x8xi1> to vector<4x8x8xi1>
    %18 = vector.broadcast %cst_16 : f32 to vector<4x8x8xf32>
    %19 = arith.select %17, %18, %9 : vector<4x8x8xi1>, vector<4x8x8xf32>
    %c0_17 = arith.constant 0 : index
    %c0_18 = arith.constant 0 : index
    %c0_19 = arith.constant 0 : index
    %20 = vector.load %arg9[%c0_17, %c0_18, %c0_19] : memref<4x8x1xf32, #tpu.memory_space<vmem>>, vector<4x8x1xf32>
    %cst_20 = arith.constant dense<0xFF800000> : vector<4x8xf32>
    %21 = vector.multi_reduction <maximumf>, %19, %cst_20 [2] : vector<4x8x8xf32> to vector<4x8xf32>
    %22 = vector.shape_cast %21 : vector<4x8xf32> to vector<4x8x1xf32>
    %23 = arith.maximumf %20, %22 : vector<4x8x1xf32>
    %24 = arith.subf %20, %23 : vector<4x8x1xf32>
    %25 = math.exp %24 : vector<4x8x1xf32>
    %26 = vector.broadcast %23 : vector<4x8x1xf32> to vector<4x8x8xf32>
    %27 = arith.subf %19, %26 : vector<4x8x8xf32>
    %28 = math.exp %27 : vector<4x8x8xf32>
    %c0_21 = arith.constant 0 : index
    %c0_22 = arith.constant 0 : index
    %c0_23 = arith.constant 0 : index
    %29 = vector.load %arg10[%c0_21, %c0_22, %c0_23] : memref<4x8x1xf32, #tpu.memory_space<vmem>>, vector<4x8x1xf32>
    %30 = arith.mulf %25, %29 : vector<4x8x1xf32>
    %cst_24 = arith.constant dense<0.000000e+00> : vector<4x8xf32>
    %31 = vector.multi_reduction <add>, %28, %cst_24 [2] : vector<4x8x8xf32> to vector<4x8xf32>
    %32 = vector.shape_cast %31 : vector<4x8xf32> to vector<4x8x1xf32>
    %33 = arith.addf %30, %32 : vector<4x8x1xf32>
    %c0_25 = arith.constant 0 : index
    %c0_26 = arith.constant 0 : index
    %c0_27 = arith.constant 0 : index
    %34 = vector.load %arg10[%c0_25, %c0_26, %c0_27] : memref<4x8x1xf32, #tpu.memory_space<vmem>>, vector<4x8x1xf32>
    tpu.vector_store %arg10[%c0_25, %c0_26, %c0_27], %33 {strides = array<i32>} : memref<4x8x1xf32, #tpu.memory_space<vmem>>, vector<4x8x1xf32>,
    %c0_28 = arith.constant 0 : index
    %c0_29 = arith.constant 0 : index
    %c0_30 = arith.constant 0 : index
    %35 = vector.load %arg11[%c0_28, %c0_29, %c0_30] : memref<4x8x8xf32, #tpu.memory_space<vmem>>, vector<4x8x8xf32>
    %36 = vector.broadcast %25 : vector<4x8x1xf32> to vector<4x8x8xf32>
    %37 = arith.mulf %36, %35 : vector<4x8x8xf32>
    %38 = arith.truncf %28 : vector<4x8x8xf32> to vector<4x8x8xbf16>
    "tpu.trace_start"() <{level = 10 : i32, message = "hqk,hkd->hqd"}> : () -> ()
    %cst_31 = arith.constant dense<0.000000e+00> : vector<4x8x8xf32>
    %39 = tpu.matmul %38, %8, %cst_31 {dimension_numbers = #tpu.dot_dimension_numbers<[2], [1], [1], [2], [0, 0, 0, 1, 1, 2], [0], [0]>} : vector<4x8x8xbf16>, vector<4x8x8xbf16>, vector<4x8x8xf32> -> vector<4x8x8xf32>
    "tpu.trace_stop"() : () -> ()
    %40 = arith.addf %37, %39 : vector<4x8x8xf32>
    %c0_32 = arith.constant 0 : index
    %c0_33 = arith.constant 0 : index
    %c0_34 = arith.constant 0 : index
    %41 = vector.load %arg11[%c0_32, %c0_33, %c0_34] : memref<4x8x8xf32, #tpu.memory_space<vmem>>, vector<4x8x8xf32>
    tpu.vector_store %arg11[%c0_32, %c0_33, %c0_34], %40 {strides = array<i32>} : memref<4x8x8xf32, #tpu.memory_space<vmem>>, vector<4x8x8xf32>,
    %c0_35 = arith.constant 0 : index
    %c0_36 = arith.constant 0 : index
    %c0_37 = arith.constant 0 : index
    %42 = vector.load %arg9[%c0_35, %c0_36, %c0_37] : memref<4x8x1xf32, #tpu.memory_space<vmem>>, vector<4x8x1xf32>
    tpu.vector_store %arg9[%c0_35, %c0_36, %c0_37], %23 {strides = array<i32>} : memref<4x8x1xf32, #tpu.memory_space<vmem>>, vector<4x8x1xf32>,
    %c0_i32_38 = arith.constant 0 : i32
    %43 = arith.cmpi eq, %arg2, %c0_i32_38 : i32
    %44 = arith.extui %43 : i1 to i32
    %c0_i32_39 = arith.constant 0 : i32
    %45 = arith.cmpi ne, %44, %c0_i32_39 : i32
    scf.if %45 {
      %c0_40 = arith.constant 0 : index
      %c0_41 = arith.constant 0 : index
      %c0_42 = arith.constant 0 : index
      %46 = vector.load %arg10[%c0_40, %c0_41, %c0_42] : memref<4x8x1xf32, #tpu.memory_space<vmem>>, vector<4x8x1xf32>
      %47 = tpu.reciprocal %46 {approx = true} : vector<4x8x1xf32> -> vector<4x8x1xf32>
      %cst_43 = arith.constant 0.000000e+00 : f32
      %48 = vector.broadcast %cst_43 : f32 to vector<8x32xf32>
      %c0_44 = arith.constant 0 : index
      %c0_45 = arith.constant 0 : index
      %c0_46 = arith.constant 0 : index
      %49 = vector.load %arg11[%c0_44, %c0_45, %c0_46] : memref<4x8x8xf32, #tpu.memory_space<vmem>>, vector<1x8x8xf32>
      %50 = vector.shape_cast %49 : vector<1x8x8xf32> to vector<8x8xf32>
      %51 = vector.extract_strided_slice %47 {offsets = [0, 0, 0], sizes = [1, 8, 1], strides = [1, 1, 1]} : vector<4x8x1xf32> to vector<1x8x1xf32>
      %52 = vector.shape_cast %51 : vector<1x8x1xf32> to vector<8x1xf32>
      %53 = vector.broadcast %52 : vector<8x1xf32> to vector<8x8xf32>
      %54 = arith.mulf %50, %53 : vector<8x8xf32>
      %55 = arith.truncf %54 : vector<8x8xf32> to vector<8x8xbf16>
      %c0_47 = arith.constant 0 : index
      %c0_48 = arith.constant 0 : index
      %c0_49 = arith.constant 0 : index
      %56 = vector.load %arg7[%c0_47, %c0_48, %c0_49] : memref<4x8x32xbf16, #tpu.memory_space<vmem>>, vector<1x8x32xbf16>
      %57 = vector.shape_cast %56 : vector<1x8x32xbf16> to vector<8x32xbf16>
      %cst_50 = arith.constant dense<0.000000e+00> : vector<8x32xf32>
      %58 = tpu.matmul %55, %57, %cst_50 {dimension_numbers = #tpu.dot_dimension_numbers<[1], [0], [0], [1], [0, 0, 1, 1], [], []>} : vector<8x8xbf16>, vector<8x32xbf16>, vector<8x32xf32> -> vector<8x32xf32>
      %59 = arith.addf %48, %58 : vector<8x32xf32>
      %c1 = arith.constant 1 : index
      %c0_51 = arith.constant 0 : index
      %c0_52 = arith.constant 0 : index
      %60 = vector.load %arg11[%c1, %c0_51, %c0_52] : memref<4x8x8xf32, #tpu.memory_space<vmem>>, vector<1x8x8xf32>
      %61 = vector.shape_cast %60 : vector<1x8x8xf32> to vector<8x8xf32>
      %62 = vector.extract_strided_slice %47 {offsets = [1, 0, 0], sizes = [1, 8, 1], strides = [1, 1, 1]} : vector<4x8x1xf32> to vector<1x8x1xf32>
      %63 = vector.shape_cast %62 : vector<1x8x1xf32> to vector<8x1xf32>
      %64 = vector.broadcast %63 : vector<8x1xf32> to vector<8x8xf32>
      %65 = arith.mulf %61, %64 : vector<8x8xf32>
      %66 = arith.truncf %65 : vector<8x8xf32> to vector<8x8xbf16>
      %c1_53 = arith.constant 1 : index
      %c0_54 = arith.constant 0 : index
      %c0_55 = arith.constant 0 : index
      %67 = vector.load %arg7[%c1_53, %c0_54, %c0_55] : memref<4x8x32xbf16, #tpu.memory_space<vmem>>, vector<1x8x32xbf16>
      %68 = vector.shape_cast %67 : vector<1x8x32xbf16> to vector<8x32xbf16>
      %cst_56 = arith.constant dense<0.000000e+00> : vector<8x32xf32>
      %69 = tpu.matmul %66, %68, %cst_56 {dimension_numbers = #tpu.dot_dimension_numbers<[1], [0], [0], [1], [0, 0, 1, 1], [], []>} : vector<8x8xbf16>, vector<8x32xbf16>, vector<8x32xf32> -> vector<8x32xf32>
      %70 = arith.addf %59, %69 : vector<8x32xf32>
      %c2 = arith.constant 2 : index
      %c0_57 = arith.constant 0 : index
      %c0_58 = arith.constant 0 : index
      %71 = vector.load %arg11[%c2, %c0_57, %c0_58] : memref<4x8x8xf32, #tpu.memory_space<vmem>>, vector<1x8x8xf32>
      %72 = vector.shape_cast %71 : vector<1x8x8xf32> to vector<8x8xf32>
      %73 = vector.extract_strided_slice %47 {offsets = [2, 0, 0], sizes = [1, 8, 1], strides = [1, 1, 1]} : vector<4x8x1xf32> to vector<1x8x1xf32>
      %74 = vector.shape_cast %73 : vector<1x8x1xf32> to vector<8x1xf32>
      %75 = vector.broadcast %74 : vector<8x1xf32> to vector<8x8xf32>
      %76 = arith.mulf %72, %75 : vector<8x8xf32>
      %77 = arith.truncf %76 : vector<8x8xf32> to vector<8x8xbf16>
      %c2_59 = arith.constant 2 : index
      %c0_60 = arith.constant 0 : index
      %c0_61 = arith.constant 0 : index
      %78 = vector.load %arg7[%c2_59, %c0_60, %c0_61] : memref<4x8x32xbf16, #tpu.memory_space<vmem>>, vector<1x8x32xbf16>
      %79 = vector.shape_cast %78 : vector<1x8x32xbf16> to vector<8x32xbf16>
      %cst_62 = arith.constant dense<0.000000e+00> : vector<8x32xf32>
      %80 = tpu.matmul %77, %79, %cst_62 {dimension_numbers = #tpu.dot_dimension_numbers<[1], [0], [0], [1], [0, 0, 1, 1], [], []>} : vector<8x8xbf16>, vector<8x32xbf16>, vector<8x32xf32> -> vector<8x32xf32>
      %81 = arith.addf %70, %80 : vector<8x32xf32>
      %c3 = arith.constant 3 : index
      %c0_63 = arith.constant 0 : index
      %c0_64 = arith.constant 0 : index
      %82 = vector.load %arg11[%c3, %c0_63, %c0_64] : memref<4x8x8xf32, #tpu.memory_space<vmem>>, vector<1x8x8xf32>
      %83 = vector.shape_cast %82 : vector<1x8x8xf32> to vector<8x8xf32>
      %84 = vector.extract_strided_slice %47 {offsets = [3, 0, 0], sizes = [1, 8, 1], strides = [1, 1, 1]} : vector<4x8x1xf32> to vector<1x8x1xf32>
      %85 = vector.shape_cast %84 : vector<1x8x1xf32> to vector<8x1xf32>
      %86 = vector.broadcast %85 : vector<8x1xf32> to vector<8x8xf32>
      %87 = arith.mulf %83, %86 : vector<8x8xf32>
      %88 = arith.truncf %87 : vector<8x8xf32> to vector<8x8xbf16>
      %c3_65 = arith.constant 3 : index
      %c0_66 = arith.constant 0 : index
      %c0_67 = arith.constant 0 : index
      %89 = vector.load %arg7[%c3_65, %c0_66, %c0_67] : memref<4x8x32xbf16, #tpu.memory_space<vmem>>, vector<1x8x32xbf16>
      %90 = vector.shape_cast %89 : vector<1x8x32xbf16> to vector<8x32xbf16>
      %cst_68 = arith.constant dense<0.000000e+00> : vector<8x32xf32>
      %91 = tpu.matmul %88, %90, %cst_68 {dimension_numbers = #tpu.dot_dimension_numbers<[1], [0], [0], [1], [0, 0, 1, 1], [], []>} : vector<8x8xbf16>, vector<8x32xbf16>, vector<8x32xf32> -> vector<8x32xf32>
      %92 = arith.addf %81, %91 : vector<8x32xf32>
      %93 = arith.truncf %92 : vector<8x32xf32> to vector<8x32xbf16>
      %c0_69 = arith.constant 0 : index
      %c0_70 = arith.constant 0 : index
      %c0_71 = arith.constant 0 : index
      %94 = vector.load %arg8[%c0_69, %c0_70, %c0_71] : memref<1x8x32xbf16, #tpu.memory_space<vmem>>, vector<1x8x32xbf16>
      %95 = vector.shape_cast %94 : vector<1x8x32xbf16> to vector<8x32xbf16>
      %96 = vector.shape_cast %93 : vector<8x32xbf16> to vector<1x8x32xbf16>
      tpu.vector_store %arg8[%c0_69, %c0_70, %c0_71], %96 {strides = array<i32>} : memref<1x8x32xbf16, #tpu.memory_space<vmem>>, vector<1x8x32xbf16>,
    } else {
    }
    return
  }
  func.func @transform_0(%arg0: i32, %arg1: i32, %arg2: i32) -> (i32, i32, i32, i32) {
    %c0_i32 = arith.constant 0 : i32
    %c0_i32_0 = arith.constant 0 : i32
    %c0_i32_1 = arith.constant 0 : i32
    return %arg0, %c0_i32, %arg1, %c0_i32_0 : i32, i32, i32, i32
  }
  func.func @transform_1(%arg0: i32, %arg1: i32, %arg2: i32) -> (i32, i32, i32, i32) {
    %c0_i32 = arith.constant 0 : i32
    %c0_i32_0 = arith.constant 0 : i32
    %c0_i32_1 = arith.constant 0 : i32
    return %arg0, %c0_i32, %arg2, %c0_i32_0 : i32, i32, i32, i32
  }
  func.func @transform_2(%arg0: i32, %arg1: i32, %arg2: i32) -> (i32, i32, i32, i32) {
    %c0_i32 = arith.constant 0 : i32
    %c0_i32_0 = arith.constant 0 : i32
    %c0_i32_1 = arith.constant 0 : i32
    return %arg0, %c0_i32, %arg2, %c0_i32_0 : i32, i32, i32, i32
  }
  func.func @transform_3(%arg0: i32, %arg1: i32, %arg2: i32) -> (i32, i32, i32) {
    %c0_i32 = arith.constant 0 : i32
    return %arg0, %arg1, %arg2 : i32, i32, i32
  }
  func.func @transform_4(%arg0: i32, %arg1: i32, %arg2: i32) -> (i32, i32, i32) {
    %c0_i32 = arith.constant 0 : i32
    %c0_i32_0 = arith.constant 0 : i32
    %c0_i32_1 = arith.constant 0 : i32
    %c0_i32_2 = arith.constant 0 : i32
    return %c0_i32, %c0_i32_0, %c0_i32_1 : i32, i32, i32
  }
  func.func @transform_5(%arg0: i32, %arg1: i32, %arg2: i32) -> (i32, i32, i32) {
    %c0_i32 = arith.constant 0 : i32
    %c0_i32_0 = arith.constant 0 : i32
    return %arg0, %arg1, %c0_i32 : i32, i32, i32
  }
}

</mosaic_0001>

<bundles_post_ra>
// kernel: tpu_custom_call.1
= control target key start
LH: loop header
LB: loop body
LE: loop exit
PB: predicated region body
PF: predicated region fallthrough
CT: control target
= control target key end

     0   :  { %s2359_s0 = inlined_call_operand.hbm [shape: bf16[2,4,8,8], index: 0, kind: input, shape index: {}]   ;;  %s2360_s1 = inlined_call_operand.hbm [shape: bf16[2,4,8,8], index: 1, kind: input, shape index: {}]   ;;  %s2361_s2 = inlined_call_operand.hbm [shape: bf16[2,4,8,8], index: 2, kind: input, shape index: {}]   ;;  %s2362_s3 = inlined_call_operand.vmem [shape: s8[2,8,8], index: 3, kind: input, shape index: {}]   ;;  %s2363_s4 = inlined_call_operand.hbm [shape: bf16[4,8,32], index: 4, kind: input, shape index: {}]   ;;  %s2364_s5 = inlined_call_operand.hbm [shape: bf16[2,8,32], index: 5, kind: output, shape index: {}]  }
   0x1   :  { %2384 = sst [smem:[#allocation23_spill]] %s2359_s0 }
   0x2   :  { %2385 = sst [smem:[#allocation24_spill]] %s2360_s1 }
   0x3   :  { %10 = vsyncpa [#allocation6], 0 }
   0x4   :  { %12 = vsyncpa [#allocation6 + $0x1], 0 }
   0x5   :  { %13 = vsyncpa [#allocation9], 0 }
   0x6   :  { %15 = vsyncpa [#allocation9 + $0x1], 0 }
   0x7   :  { %16 = vsyncpa [#allocation12], 0 }
   0x8   :  { %17 = vsyncpa [#allocation7], 0 }
   0x9   :  { %19 = vsyncpa [#allocation7 + $0x1], 0  ;;  %s1882_s18 = smov 0   ;;  %s1884_s19 = smov 0  }
   0xa   :  { %s1886_s20 = smov 0   ;;  %s1888_s21 = smov 0  }
   0xb   :  { %s1890_s22 = smov 0   ;;  %s1892_s23 = smov 0  }
   0xc LB: > { %2386 = sst [smem:[#allocation18_spill]] %s1827_s20  ;;  %s44_s24 = sadd.s32 1, %s1835_s22  ;;  %s1839_s23 = sphi %s1892_s23, %s25_s23   ;;  %s1835_s22 = sphi %s1890_s22, %s2418_s22   ;;  %s1831_s21 = sphi %s1888_s21, %s2417_s21   ;;  %s1827_s20 = sphi %s1886_s20, %s2416_s20   ;;  %s1823_s19 = sphi %s1884_s19, %s2420_s19   ;;  %s1819_s18 = sphi %s1882_s18, %s2419_s18  }
   0xd   : > { %2387 = sst [smem:[#allocation19_spill]] %s1835_s22  ;;  %s53_s25 = sadd.s32 1, %s1827_s20 }
   0xe   : > { %2388 = sst [smem:[#allocation20_spill]] %s1839_s23  ;;  %p46_p0 = scmp.ge.s32.totalorder %s44_s24, 2 }
   0xf   : > { %p2365_p1 = scmp.ne.s32.totalorder %s1827_s20, %s1823_s19  ;;  %p61_p2 = scmp.eq.s32.totalorder %s1839_s23, 0 }
  0x10   : > { %s2422_s24 = smov (%p46_p0, %s44_s24), 0  ;;  %p1547_p6 = scmp.lt.s32.totalorder %s1839_s23, 2 }
  0x11   : > { %2389 = sst [smem:[#allocation21_spill]] %s2422_s24  ;;  %p62_p3 = por %p61_p2, %p2365_p1 }
  0x12   : > { %s48_s26 = ssub.s32 %s1835_s22, %s2422_s24  ;;  %s2370_s27 = sand.u32 1, %s1827_s20  }
  0x13   : > { %p51_p5 = scmp.eq.s32.totalorder %s48_s26, 0  ;;  %s1928_s28 = sshll.u32 %s1835_s22, 8 }
  0x14   : > { %s1935_s30 = sshll.u32 %s2370_s27, 4  ;;  %p1937_p7 = pnand %p1547_p6, %p62_p3 }
  0x15   : > { %s1931_s29 = scalar_select %p51_p5, %s1827_s20, %s53_s25  }
  0x16   : > { %s2391_s6 = scalar_select %p1937_p7, 1, 0 }
  0x17   : > { %2390 = sst [smem:[#allocation22_spill]] %s1931_s29  ;;  %s260_s7 = sand.u32 1, %s1839_s23  }
  0x18   : > { %s2392_s1 = sld [smem:[#allocation24_spill]]  ;;  %s264_s11 = scalar_lea.vmem [#allocation8], %s1935_s30 }
  0x19   : > { %s272_s12 = sshll.u32 %s264_s11, 4  ;;  %s1951_s13 = scalar_lea.sflag [#allocation9], %s260_s7  ;;  %s1949_s12 = int_to_ptr.vmem [resolvable:$true] %s272_s12 }
  0x1a   : > { %p1957_p9 = pneg %p1937_p7 }
  0x1c   : > { %s2393_s15 = scalar_select %p1957_p9, 1, 0 }
  0x1e   : > { %s1946_s10 = scalar_lea.hbm %s2392_s1, %s1928_s28  ;;  %s1636_s25 = scalar_lea.hbm %s2392_s1, 512 }
  0x1f   : > { %s1631_s14 = scalar_lea.hbm %s1946_s10, 256  ;;  %p1637_p12 = scmp.lt.u32.totalorder %s1946_s10, %s2392_s1 }
  0x20   : > { %p1632_p8 = scmp.ne.s32.totalorder %s1946_s10, %s1631_s14  ;;  %p1638_p13 = scmp.lt.u32.totalorder %s1636_s25, %s1631_s14 }
  0x21   : > { %p1640_p2 = scmp.lt.u32.totalorder %s1631_s14, %s1946_s10 }
  0x22   : > { %p1634_p10 = pnand %p1957_p9, %p1632_p8  ;;  %p1639_p0 = por %p1638_p13, %p1637_p12 }
  0x24   : > { %p1635_p11 = pneg %p1634_p10  ;;  %p1641_p3 = por %p1640_p2, %p1639_p0 }
  0x26   : > { %p1642_p5 = pnand %p1641_p3, %p1635_p11 }
  0x28   : > { %1645 = shalt.err (!%p1642_p5)
}
  0x29   : > { %s1646_s7 = scalar_lea.vmem %s1949_s12, 256  ;;  %s1841_s9 = smov [#allocation8]  }
  0x2a   : > { %p1647_p6 = scmp.ne.s32.totalorder %s1949_s12, %s1646_s7  ;;  %s1651_s11 = sshll.u32 %s1841_s9, 4  ;;  %s1652_s11 = int_to_ptr.vmem [resolvable:$false] %s1651_s11 }
  0x2b   : > { %s1653_s16 = scalar_lea.vmem %s1652_s11, 512  ;;  %p1654_p4 = scmp.lt.s32.totalorder %s1949_s12, %s1652_s11 }
  0x2c   : > { %p1649_p8 = pnand %p1647_p6, %p1957_p9  ;;  %p1655_p1 = scmp.lt.s32.totalorder %s1653_s16, %s1646_s7 }
  0x2e   : > { %p1650_p10 = pneg %p1649_p8  ;;  %p1656_p12 = por %p1655_p1, %p1654_p4 }
  0x30   : > { %p1657_p13 = pnand %p1656_p12, %p1650_p10 }
  0x32   : > { %1660 = shalt.err (!%p1657_p13)
}
  0x33   : > { %s2366_s14 = smov 64   ;;  %s2368_s17 = smov 4  }
  0x34   : > { %1538 = dma.hbm_to_vmem [thread:$0]  (!%p1937_p7), %s1946_s10, 256, %s1949_s12, %s1951_s13, %s2366_s14, %s2366_s14, %s2368_s17  }
  0x35   : > { %s1985_s25 = sadd.s32 4294967295, %s1839_s23   ;;  %s1369_s26 = sadd.s32 4294967294, %s1839_s23  }
  0x36   : > { %p66_p1 = scmp.ne.s32.totalorder %s1823_s19, %s1819_s18  ;;  %p2375_p4 = scmp.eq.s32.totalorder %s1985_s25, 0 }
  0x37   : > { %p199_p11 = scmp.eq.s32.totalorder %s1985_s25, 1  ;;  %p205_p0 = scmp.eq.s32.totalorder %s1369_s26, 1 }
  0x38   : > { %p1370_p2 = scmp.ge.s32.totalorder %s1839_s23, 1  ;;  %p1995_p3 = por %p2375_p4, %p66_p1 }
  0x39   : > { %p2395_p5 = scmp.ne.s32.totalorder %s1827_s20, %s1823_s19  ;;  %p2006_p8 = por %p205_p0, %p66_p1 }
  0x3a   : > { %s2394_s8 = scalar_select %p1995_p3, 1, 0 }
  0x3b   : > { %p2002_p6 = por %p199_p11, %p2395_p5  ;;  %p212_p10 = scmp.lt.s32.totalorder %s1839_s23, 3 }
  0x3c   : > { %s2397_s12 = scalar_select %p2006_p8, 1, 0 }
  0x3d   : > { %s2396_s10 = scalar_select %p2002_p6, 1, 0 }
  0x3e   : > { %p2011_p12 = pnand %p1370_p2, %p212_p10  ;;  %s1844_s9 = smov [#allocation11]  }
  0x3f   : > { %s224_s11 = sshll.u32 %s1844_s9, 4  ;;  %s2399_s0 = sld [smem:[#allocation23_spill]]  ;;  %s2015_s11 = int_to_ptr.vmem [resolvable:$true] %s224_s11 }
  0x40   : > { %s2398_s7 = scalar_select %p2011_p12, 1, 0 }
  0x41   : > { %p1528_p13 = pneg %p2011_p12  ;;  %s242_s17 = scalar_lea.vmem [#allocation5], %s1935_s30 }
  0x42   : > { %s250_s27 = sshll.u32 %s242_s17, 4  ;;  %s2401_s9 = sand.u32 1, %s1827_s20   ;;  %s2032_s27 = int_to_ptr.vmem [resolvable:$true] %s250_s27 }
  0x43   : > { %p2028_p1 = pnand %p1528_p13, %p2375_p4  ;;  %s2036_s24 = scalar_lea.sflag [#allocation6], %s2401_s9 }
  0x45   : > { %s2023_s14 = scalar_lea.hbm %s2399_s0, %s1928_s28  ;;  %s1666_s29 = scalar_lea.hbm %s2399_s0, 512 }
  0x46   : > { %s2400_s1 = scalar_select %p2028_p1, 1, 0 }
  0x47   : > { %s1661_s22 = scalar_lea.hbm %s2023_s14, 256  ;;  %p1667_p5 = scmp.lt.u32.totalorder %s2023_s14, %s2399_s0 }
  0x48   : > { %p1662_p11 = scmp.ne.s32.totalorder %s2023_s14, %s1661_s22  ;;  %p1668_p10 = scmp.lt.u32.totalorder %s1666_s29, %s1661_s22 }
  0x49   : > { %p1670_p4 = scmp.lt.u32.totalorder %s1661_s22, %s2023_s14 }
  0x4a   : > { %p1664_p0 = pnand %p1662_p11, %p1957_p9  ;;  %p1669_p13 = por %p1668_p10, %p1667_p5 }
  0x4c   : > { %p1665_p2 = pneg %p1664_p0  ;;  %p1671_p8 = por %p1670_p4, %p1669_p13 }
  0x4e   : > { %p1672_p6 = pnand %p1671_p8, %p1665_p2 }
  0x50   : > { %1675 = shalt.err (!%p1672_p6)
}
  0x51   : > { %s1676_s9 = scalar_lea.vmem %s2032_s27, 256  ;;  %s1845_s16 = smov [#allocation5]  }
  0x52   : > { %p1677_p11 = scmp.ne.s32.totalorder %s2032_s27, %s1676_s9  ;;  %s1681_s26 = sshll.u32 %s1845_s16, 4  ;;  %s1682_s26 = int_to_ptr.vmem [resolvable:$false] %s1681_s26 }
  0x53   : > { %s1683_s23 = scalar_lea.vmem %s1682_s26, 512  ;;  %p1684_p12 = scmp.lt.s32.totalorder %s2032_s27, %s1682_s26 }
  0x54   : > { %p1679_p0 = pnand %p1677_p11, %p1957_p9  ;;  %p1685_p1 = scmp.lt.s32.totalorder %s1683_s23, %s1676_s9 }
  0x56   : > { %p1680_p3 = pneg %p1679_p0  ;;  %p1686_p5 = por %p1685_p1, %p1684_p12 }
  0x58   : > { %p1687_p10 = pnand %p1686_p5, %p1680_p3 }
  0x5a   : > { %1690 = shalt.err (!%p1687_p10)
}
  0x5b   : > { %s2402_s22 = smov 4   ;;  %s2403_s29 = smov 64  }
  0x5c   : > { %1535 = dma.hbm_to_vmem [thread:$0]  (!%p1937_p7), %s2023_s14, 256, %s2032_s27, %s2036_s24, %s2403_s29, %s2403_s29, %s2402_s22  }
  0x5d   : > { %s1691_s16 = scalar_lea.hbm %s2363_s4, 256  ;;  %p2404_p3 = scmp.ne.s32.totalorder %s2400_s1, 0 }
  0x5e   : > { %p1692_p4 = scmp.ne.s32.totalorder %s2363_s4, %s1691_s16  ;;  %p1698_p1 = scmp.lt.u32.totalorder %s1691_s16, %s2363_s4 }
  0x5f   : > { %p1693_p6 = pneg %p2404_p3 }
  0x61   : > { %p1694_p8 = pnand %p1693_p6, %p1692_p4 }
  0x63   : > { %p1695_p12 = pneg %p1694_p8 }
  0x65   : > { %p1700_p2 = pnand %p1698_p1, %p1695_p12 }
  0x67   : > { %1703 = shalt.err (!%p1700_p2)
}
  0x68   : > { %s1704_s24 = scalar_lea.vmem %s2015_s11, 256  ;;  %p1712_p5 = scmp.lt.s32.totalorder %s2015_s11, %s2015_s11 }
  0x69   : > { %p1705_p13 = scmp.ne.s32.totalorder %s2015_s11, %s1704_s24  ;;  %p1713_p10 = scmp.lt.s32.totalorder %s1704_s24, %s1704_s24 }
  0x6b   : > { %p1707_p11 = pnand %p1705_p13, %p1693_p6  ;;  %p1714_p7 = por %p1713_p10, %p1712_p5 }
  0x6d   : > { %p1708_p0 = pneg %p1707_p11 }
  0x6f   : > { %p1715_p9 = pnand %p1714_p7, %p1708_p0 }
  0x71   : > { %1718 = shalt.err (!%p1715_p9)
}
  0x72   : > { %1531 = dma.hbm_to_vmem [thread:$0]  (!%p2404_p3), %s2363_s4, 256, %s2015_s11, [#allocation12], %s2403_s29, %s2403_s29, %s2402_s22  }
  0x73   : > { %s2091_s17 = scalar_lea.hbm %s2361_s2, %s1928_s28  ;;  %s286_s1 = scalar_lea.vmem [#allocation10], %s1935_s30 }
  0x74   : > { %s294_s16 = sshll.u32 %s286_s1, 4  ;;  %s1719_s26 = scalar_lea.hbm %s2091_s17, 256  ;;  %s2094_s16 = int_to_ptr.vmem [resolvable:$true] %s294_s16 }
  0x75   : > { %p1720_p7 = scmp.ne.s32.totalorder %s2091_s17, %s1719_s26  ;;  %p2405_p9 = scmp.ne.s32.totalorder %s2393_s15, 0 }
  0x76   : > { %s1724_s23 = scalar_lea.hbm %s2361_s2, 512  ;;  %p1725_p3 = scmp.lt.u32.totalorder %s2091_s17, %s2361_s2 }
  0x77   : > { %p1722_p4 = pnand %p1720_p7, %p2405_p9  ;;  %p1726_p8 = scmp.lt.u32.totalorder %s1724_s23, %s1719_s26 }
  0x78   : > { %p1728_p1 = scmp.lt.u32.totalorder %s1719_s26, %s2091_s17 }
  0x79   : > { %p1723_p6 = pneg %p1722_p4  ;;  %p1727_p12 = por %p1726_p8, %p1725_p3 }
  0x7b   : > { %p1729_p2 = por %p1728_p1, %p1727_p12 }
  0x7d   : > { %p1730_p13 = pnand %p1729_p2, %p1723_p6 }
  0x7f   : > { %1733 = shalt.err (!%p1730_p13)
}
  0x80   : > { %s1734_s30 = scalar_lea.vmem %s2094_s16, 256  ;;  %s1846_s0 = smov [#allocation10]  }
  0x81   : > { %p1735_p11 = scmp.ne.s32.totalorder %s2094_s16, %s1734_s30  ;;  %s1739_s20 = sshll.u32 %s1846_s0, 4  ;;  %s1740_s20 = int_to_ptr.vmem [resolvable:$false] %s1739_s20 }
  0x82   : > { %s1741_s27 = scalar_lea.vmem %s1740_s20, 512  ;;  %p1742_p10 = scmp.lt.s32.totalorder %s2094_s16, %s1740_s20 }
  0x83   : > { %p1737_p0 = pnand %p1735_p11, %p2405_p9  ;;  %p1743_p7 = scmp.lt.s32.totalorder %s1741_s27, %s1734_s30 }
  0x85   : > { %p1738_p5 = pneg %p1737_p0  ;;  %p1744_p4 = por %p1743_p7, %p1742_p10 }
  0x87   : > { %p1745_p3 = pnand %p1744_p4, %p1738_p5 }
  0x89   : > { %1748 = shalt.err (!%p1745_p3)
}
  0x8a   : > { %p2406_p6 = scmp.ne.s32.totalorder %s2391_s6, 0  ;;  %p2407_p9 = scmp.ne.s32.totalorder %s2398_s7, 0 }
  0x8b   : > { %s2124_s15 = sand.u32 (!%p2407_p9), 1, %s1823_s19   ;;  %p2408_p8 = scmp.ne.s32.totalorder (!%p2407_p9), %s2394_s8, 0 }
  0x8c   : > { %1541 = dma.hbm_to_vmem [thread:$0]  (!%p2406_p6), %s2091_s17, 256, %s2094_s16, %s1951_s13, %s2403_s29, %s2403_s29, %s2402_s22  }
  0x8d   : > { %319 = sbr.rel (%p2407_p9) target bundleno = 1234 (0x4d2), region = 40  ;;  %s1383_s14 = sshll.u32 (!%p2407_p9), %s2124_s15, 4 }
  0x8e   : > { %s322_s1 = scalar_lea.sflag (!%p2407_p9), [#allocation6], %s2124_s15  ;;  %s2128_s26 = scalar_lea.vmem (!%p2407_p9), [#allocation5], %s1383_s14 }
  0x94   : > { %1802 = dma.done.wait (%p2408_p8), %s322_s1, 256  }
  0x95   : > { %1804 = vsyncadd (%p2408_p8), %s322_s1, 4294967040  ;;  %s330_s6 = sand.u32 1, %s1985_s25   ;;  %s2135_s7 = scalar_lea.vmem [#allocation8], %s1383_s14 }
  0x96   : > { %s331_s13 = scalar_lea.sflag [#allocation9], %s330_s6 }
  0x97   : > { %1806 = dma.done.wait (%p2408_p8), %s331_s13, 512  }
  0x98   : > { %1808 = vsyncadd (%p2408_p8), %s331_s13, 4294966784  ;;  %s2141_s22 = scalar_lea.vmem [#allocation10], %s1383_s14  ;;  %p2409_p12 = scmp.eq.s32.totalorder %s1985_s25, 0 }
  0x9a   : > { %1810 = dma.done.wait (%p2409_p12), [#allocation12], 256   ;;  %p2410_p1 = pmov %p2409_p12 }
  0x9b   : > { %vm418_vm0 = vcmask 64512   ;;  %v1847_v0 = vmov 0.0   ;;  %vm1848_vm1 = vmmov 0   ;;  %v427_v1 = vld [vmem:[%s2135_s7] sm:$0xf]  ;;  %vm409_vm2 = vcmask 7168  }
  0x9c   : > { %1812 = vsyncadd (%p2410_p1), [#allocation12], 4294967040  ;;  %1432 = vmatprep.subr.bf16.mxu1 %v1847_v0  ;;  %419 = vst.msk [vmem:[#allocation4] sm:$0xff] %vm418_vm0, %v1847_v0  ;;  %1434 = vmatprep.mubr.msk.bf16.mxu1 %vm1848_vm1, %v1847_v0  ;;  %v440_v2 = vsel %vm418_vm0, %v427_v1, 0  ;;  %v428_v3 = vld [vmem:[%s2135_s7 + $0x4] sm:$0xf] }
  0x9d   : > { %420 = vst.msk [vmem:[#allocation4 + $0x8] sm:$0xff] %vm418_vm0, %v1847_v0  ;;  %421 = vst.msk [vmem:[#allocation4 + $0x10] sm:$0xff] %vm418_vm0, %v1847_v0  ;;  %1456 = vmatprep.subr.bf16.mxu0 %v1847_v0  ;;  %1458 = vmatprep.mubr.msk.bf16.mxu0 %vm1848_vm1, %v1847_v0  ;;  %v423_v4 = vld [vmem:[%s2128_s26] sm:$0xf]  ;;  %v486_v5 = vsel %vm418_vm0, %v428_v3, 0  ;;  %v1849_v13 = vmov -inf  }
  0x9e   : > { %422 = vst.msk [vmem:[#allocation4 + $0x18] sm:$0xff] %vm418_vm0, %v1847_v0  ;;  %1433 = vmatpush3.bf16.xpose.msra.mxu1 %v440_v2  ;;  %v429_v6 = vld [vmem:[%s2135_s7 + $0x8] sm:$0xf]  ;;  %v424_v7 = vld [vmem:[%s2128_s26 + $0x4] sm:$0xf]  ;;  %p394_p2 = scmp.lt.s32.totalorder %s1831_s21, 1 }
  0x9f   : > { %1438 = vmatprep.subr.bf16.mxu1 %v1847_v0  ;;  %v532_v8 = vsel %vm418_vm0, %v429_v6, 0  ;;  %v430_v9 = vld [vmem:[%s2135_s7 + $0xc] sm:$0xf]  ;;  %v425_v10 = vld [vmem:[%s2128_s26 + $0x8] sm:$0xf]  ;;  %411 = vst.msk [vmem:[#allocation2 + $0x8] sm:$0xff] %vm409_vm2, %v1849_v13 }
  0xa0   : > { %v578_v11 = vsel %vm418_vm0, %v430_v9, 0  ;;  %v426_v12 = vld [vmem:[%s2128_s26 + $0xc] sm:$0xf]  ;;  %410 = vst.msk [vmem:[#allocation2] sm:$0xff] %vm409_vm2, %v1849_v13  ;;  %412 = vst.msk [vmem:[#allocation2 + $0x10] sm:$0xff] %vm409_vm2, %v1849_v13  ;;  %s395_s25 = scalar_select %p394_p2, %s1831_s21, 1 }
  0xa1   : > { %413 = vst.msk [vmem:[#allocation2 + $0x18] sm:$0xff] %vm409_vm2, %v1849_v13  ;;  %414 = vst.msk [vmem:[#allocation3] sm:$0xff] %vm409_vm2, %v1847_v0  ;;  %v1850_v40 = vmov 0   ;;  %v432_v55 = vld [vmem:[%s2141_s22 + $0x4] sm:$0xf]  ;;  %vm758_vm4 = vcmask 1043456  }
  0xa2   : > { %415 = vst.msk [vmem:[#allocation3 + $0x8] sm:$0xff] %vm409_vm2, %v1847_v0  ;;  %416 = vst.msk [vmem:[#allocation3 + $0x10] sm:$0xff] %vm409_vm2, %v1847_v0  ;;  %s1388_s8 = sshll.u32 %s395_s25, 1  ;;  %1605 = vset.pattern.permute.xlu0 %v1850_v40  ;;  %1606 = vset.pattern.permute.xlu1 %v1850_v40  ;;  %v806_v57 = vsel %vm758_vm4, %v432_v55, 0  ;;  %v431_v60 = vld [vmem:[%s2141_s22] sm:$0xf] }
  0xa3   : > { %417 = vst.msk [vmem:[#allocation3 + $0x18] sm:$0xff] %vm409_vm2, %v1847_v0  ;;  %s403_s16 = scalar_lea.vmem %s2362_s3, %s1388_s8  ;;  %v760_v61 = vsel %vm758_vm4, %v431_v60, 0  ;;  %s1387_s9 = sshll.u32 %s2124_s15, 2  ;;  %vm1192_vm5 = vcmask 257024  }
  0xa4   : > { %v620_v14 = vld [vmem:[%s403_s16] sm:$0x3]  ;;  %1457 = vmatpush3.bf16.msra.mxu0 %v760_v61  ;;  %v724_v61 = vld [vmem:[#allocation4 + $0x8] sm:$0xff]  ;;  %s1402_s11 = sshll.u32 %s1831_s21, 6  ;;  %s393_s23 = scalar_lea.vmem [#allocation13], %s1387_s9 }
  0xa5   : > { %1435 = vmatmul.mubr.msk.bf16.vlgmr.msra.gmra.mrb[0].mxu1 %vm418_vm0, %v423_v4  ;;  %v621_v16 = vunpack.c.0.s8 %v620_v14  ;;  %1468 = vmatprep.subr.bf16.mxu0 %v1847_v0  ;;  %s1209_s24 = sshll.u32 %s393_s23, 4  ;;  %s2310_s0 = scalar_lea.hbm %s2364_s5, %s1402_s11  ;;  %s2312_s24 = int_to_ptr.vmem [resolvable:$true] %s1209_s24 }
  0xa6   : > { %1439 = vmatpush3.bf16.xpose.msra.mxu1 %v486_v5  ;;  %1440 = vmatprep.mubr.msk.bf16.mxu1 %vm1848_vm1, %v1847_v0  ;;  %v2217_v42 = vld [vmem:[#allocation2 + $0x8] sm:$0xff]  ;;  %s1195_s21 = scalar_lea.sflag [#allocation7], %s2124_s15  ;;  %s1749_s20 = scalar_lea.vmem %s2312_s24, 64 }
  0xa7   : > { %1444 = vmatprep.subr.bf16.mxu1 %v1847_v0  ;;  %v622_v20 = vcvt.s32.f32 %v621_v16  ;;  %v2222_v45 = vld [vmem:[#allocation2] sm:$0xff]  ;;  %v2232_v49 = vld [vmem:[#allocation2 + $0x10] sm:$0xff]  ;;  %p1750_p13 = scmp.ne.s32.totalorder %s2312_s24, %s1749_s20  ;;  %p2411_p11 = scmp.ne.s32.totalorder %s2396_s10, 0 }
  0xa8   : > { %v633_v54 = vld [vmem:[#allocation2 + $0x18] sm:$0xff]  ;;  %s1851_s27 = smov [#allocation13]  }
  0xa9   : > { %vm623_vm3 = vcmp.eq.f32.partialorder %v622_v20, 0.0  ;;  %p1751_p0 = pnand %p1750_p13, %p2411_p11  ;;  %s1753_s14 = sshll.u32 %s1851_s27, 4  ;;  %s1754_s14 = int_to_ptr.vmem [resolvable:$false] %s1753_s14 }
  0xaa   : > { %s1755_s1 = scalar_lea.vmem %s1754_s14, 128  ;;  %p1756_p10 = scmp.lt.s32.totalorder %s2312_s24, %s1754_s14 }
  0xab   : > { %p1752_p5 = pneg %p1751_p0  ;;  %p1757_p7 = scmp.lt.s32.totalorder %s1755_s1, %s1749_s20 }
  0xad   : > { %1441 = vmatmul.mubr.msk.bf16.vlgmr.msra.gmra.mrb[4].mxu1 %vm418_vm0, %v424_v7  ;;  %p1758_p4 = por %p1757_p7, %p1756_p10 }
  0xae   : > { %1445 = vmatpush3.bf16.xpose.msra.mxu1 %v532_v8  ;;  %1446 = vmatprep.mubr.msk.bf16.mxu1 %vm1848_vm1, %v1847_v0  ;;  %v434_v8 = vld [vmem:[%s2141_s22 + $0xc] sm:$0xf] }
  0xaf   : > { %1450 = vmatprep.subr.bf16.mxu1 %v1847_v0  ;;  %v898_v13 = vsel %vm758_vm4, %v434_v8, 0  ;;  %p1759_p3 = pnand %p1758_p4, %p1752_p5 }
  0xb5   : > { %1447 = vmatmul.mubr.msk.bf16.vlgmr.msra.gmra.mrb[8].mxu1 %vm418_vm0, %v425_v10 }
  0xb6   : > { %1451 = vmatpush3.bf16.xpose.msra.mxu1 %v578_v11  ;;  %1452 = vmatprep.mubr.msk.bf16.mxu1 %vm1848_vm1, %v1847_v0 }
  0xb7   : > { %1462 = vmatprep.subr.bf16.mxu1 %v1847_v0 }
  0xbd   : > { %1453 = vmatmul.mubr.msk.bf16.vlgmr.msra.gmra.mrb[12].mxu1 %vm418_vm0, %v426_v12 }
  0xbe   : > { %1464 = vmatprep.mubr.msk.bf16.mxu1 %vm1848_vm1, %v1847_v0  ;;  %1463 = vmatpush3.bf16.msra.mxu1 %v806_v57 }
  0xbf   : > { %1474 = vmatprep.subr.bf16.mxu1 %v1847_v0 }
 0x178   : > { %v476_v15 = vpop.f32.mrb[0].mxu1 }
 0x179   : > { %v1436_v17 = vpop.f32.mrb[1].mxu1  ;;  %v626_v26 = vsel %vm623_vm3, -1e+09, %v476_v15  ;;  %v433_v15 = vld [vmem:[%s2141_s22 + $0x8] sm:$0xf] }
 0x17a   : > { %v479_v18 = vpop.f32.mrb[2].mxu1  ;;  %v634_v28 = vsel %vm418_vm0, %v626_v26, -inf  ;;  %v852_v20 = vsel %vm758_vm4, %v433_v15, 0 }
 0x17b   : > { %v1437_v19 = vpop.f32.mrb[3].mxu1 }
 0x180   : > { %v522_v21 = vpop.f32.mrb[4].mxu1 }
 0x181   : > { %v627_v22 = vsel %vm623_vm3, -1e+09, %v522_v21  ;;  %v1442_v23 = vpop.f32.mrb[5].mxu1 }
 0x182   : > { %v525_v24 = vpop.f32.mrb[6].mxu1  ;;  %v637_v25 = vsel %vm418_vm0, %v627_v22, -inf }
 0x183   : > { %638 = vmax.xlane.f32.xlu0 %v637_v25  ;;  %v1443_v27 = vpop.f32.mrb[7].mxu1 }
 0x187   : > { %635 = vmax.xlane.f32.xlu0 %v634_v28 }
 0x188   : > { %v568_v29 = vpop.f32.mrb[8].mxu1 }
 0x189   : > { %v628_v30 = vsel %vm623_vm3, -1e+09, %v568_v29  ;;  %v1448_v31 = vpop.f32.mrb[9].mxu1 }
 0x18a   : > { %v640_v32 = vsel %vm418_vm0, %v628_v30, -inf  ;;  %v571_v33 = vpop.f32.mrb[10].mxu1 }
 0x18b   : > { %641 = vmax.xlane.f32.xlu1 %v640_v32  ;;  %v1449_v34 = vpop.f32.mrb[11].mxu1  ;;  %v982_v33 = vld [vmem:[#allocation11 + $0x4] sm:$0xf] }
 0x18c   : > { %v987_v34 = vsel %vm758_vm4, %v982_v33, 0 }
 0x190   : > { %v614_v35 = vpop.f32.mrb[12].mxu1 }
 0x191   : > { %v2213_v36 = vsel %vm623_vm3, -1e+09, %v614_v35  ;;  %v1454_v37 = vpop.f32.mrb[13].mxu1 }
 0x192   : > { %v643_v38 = vsel %vm418_vm0, %v2213_v36, -inf  ;;  %v617_v39 = vpop.f32.mrb[14].mxu1 }
 0x193   : > { %644 = vmax.xlane.f32.xlu1 %v643_v38  ;;  %v1455_v41 = vpop.f32.mrb[15].mxu1  ;;  %v694_v39 = vld [vmem:[#allocation3] sm:$0xff] }
 0x210   : > { %v639_v43 = vpop.xlane.xlu0 %638 }
 0x211   : > { %v2220_v44 = vmax.f32 %v2217_v42, %v639_v43 }
 0x213   : > { %v651_v46 = vsub.f32 %v2217_v42, %v2220_v44  ;;  %949 = vst.msk [vmem:[#allocation2 + $0x8] sm:$0xff] %vm409_vm2, %v2220_v44  ;;  %669 = vperm.xlu0 %1605, %v2220_v44   ;;  %v696_v44 = vld [vmem:[#allocation3 + $0x10] sm:$0xff] }
 0x214   : > { %v636_v47 = vpop.xlane.xlu0 %635 }
 0x215   : > { %v2230_v48 = vmax.f32 %v2222_v45, %v636_v47  ;;  %v656_v29 = vmul.f32 1.442695, %v651_v46 }
 0x217   : > { %v650_v50 = vsub.f32 %v2222_v45, %v2230_v48  ;;  %948 = vst.msk [vmem:[#allocation2] sm:$0xff] %vm409_vm2, %v2230_v48  ;;  %664 = vperm.xlu1 %1606, %v2230_v48  }
 0x218   : > { %v642_v51 = vpop.xlane.xlu1 %641 }
 0x219   : > { %v2240_v52 = vmax.f32 %v2232_v49, %v642_v51  ;;  %v654_v23 = vmul.f32 1.442695, %v650_v50  ;;  %v697_v50 = vld [vmem:[#allocation3 + $0x18] sm:$0xff] }
 0x21b   : > { %v652_v53 = vsub.f32 %v2232_v49, %v2240_v52  ;;  %950 = vst.msk [vmem:[#allocation2 + $0x10] sm:$0xff] %vm409_vm2, %v2240_v52  ;;  %674 = vperm.xlu1 %1606, %v2240_v52  }
 0x21d   : > { %v658_v35 = vmul.f32 1.442695, %v652_v53 }
 0x220   : > { %v645_v56 = vpop.xlane.xlu1 %644 }
 0x221   : > { %v649_v58 = vmax.f32 %v633_v54, %v645_v56 }
 0x223   : > { %v653_v59 = vsub.f32 %v633_v54, %v649_v58  ;;  %951 = vst.msk [vmem:[#allocation2 + $0x18] sm:$0xff] %vm409_vm2, %v649_v58  ;;  %679 = vperm.xlu1 %1606, %v649_v58  }
 0x292   : > { %v670_v62 = vpop.permute.xlu0 %669 }
 0x293   : > { %v683_v63 = vsub.f32 %v627_v22, %v670_v62 }
 0x295   : > { %v688_v1 = vmul.f32 1.442695, %v683_v63 }
 0x296   : > { %v665_v2 = vpop.permute.xlu1 %664 }
 0x297   : > { %1607 = vpow2.f32 %v688_v1  ;;  %v682_v3 = vsub.f32 %v626_v26, %v665_v2  ;;  %v660_v26 = vmul.f32 1.442695, %v653_v59  ;;  %v723_v1 = vld [vmem:[#allocation4] sm:$0xff] }
 0x299   : > { %v686_v4 = vmul.f32 1.442695, %v682_v3 }
 0x29a   : > { %v675_v5 = vpop.permute.xlu1 %674 }
 0x29b   : > { %1609 = vpow2.f32 %v686_v4  ;;  %v684_v6 = vsub.f32 %v628_v30, %v675_v5 }
 0x29d   : > { %v690_v7 = vmul.f32 1.442695, %v684_v6 }
 0x29f   : > { %1611 = vpow2.f32 %v690_v7 }
 0x2a1   : > { %v1608_v9 = vpop.eup %1607 }
 0x2a2   : > { %v680_v10 = vpop.permute.xlu1 %679  ;;  %v705_v11 = vsel %vm418_vm0, %v1608_v9, 0.0  ;;  %v752_v12 = vpack.c.bf16 %v1608_v9, %v1608_v9 }
 0x2a3   : > { %v685_v14 = vsub.f32 %v2213_v36, %v680_v10  ;;  %706 = vadd.xlane.f32.xlu1 %v705_v11  ;;  %v695_v36 = vld [vmem:[#allocation3 + $0x8] sm:$0xff] }
 0x2a4   : > { %1465 = vmatmul.mubr.msk.bf16.vlgmr.msra.gmra.mrb[16].mxu1 %vm418_vm0, %v752_v12 }
 0x2a5   : > { %v1610_v16 = vpop.eup %1609  ;;  %v692_v17 = vmul.f32 1.442695, %v685_v14  ;;  %1475 = vmatpush3.bf16.msra.mxu1 %v898_v13  ;;  %1476 = vmatprep.mubr.msk.bf16.mxu1 %vm1848_vm1, %v1847_v0  ;;  %v726_v14 = vld [vmem:[#allocation4 + $0x18] sm:$0xff] }
 0x2a6   : > { %v702_v18 = vsel %vm418_vm0, %v1610_v16, 0.0  ;;  %v751_v19 = vpack.c.bf16 %v1610_v16, %v1610_v16 }
 0x2a7   : > { %1613 = vpow2.f32 %v692_v17  ;;  %703 = vadd.xlane.f32.xlu0 %v702_v18 }
 0x2a8   : > { %1459 = vmatmul.mubr.msk.bf16.vlgmr.msra.gmra.mrb[0].mxu0 %vm418_vm0, %v751_v19  ;;  %1615 = vpow2.f32 %v654_v23 }
 0x2a9   : > { %v1612_v21 = vpop.eup %1611  ;;  %1469 = vmatpush3.bf16.msra.mxu0 %v852_v20  ;;  %1470 = vmatprep.mubr.msk.bf16.mxu0 %vm1848_vm1, %v1847_v0  ;;  %1617 = vpow2.f32 %v660_v26 }
 0x2aa   : > { %v708_v22 = vsel %vm418_vm0, %v1612_v21, 0.0  ;;  %1480 = vmatprep.subr.bf16.mxu0 %v1847_v0  ;;  %v753_v24 = vpack.c.bf16 %v1612_v21, %v1612_v21  ;;  %1619 = vpow2.f32 %v656_v29 }
 0x2ab   : > { %709 = vadd.xlane.f32.xlu1 %v708_v22  ;;  %1621 = vpow2.f32 %v658_v35 }
 0x2b0   : > { %1471 = vmatmul.mubr.msk.bf16.vlgmr.msra.gmra.mrb[4].mxu0 %vm418_vm0, %v753_v24 }
 0x2b1   : > { %v1614_v25 = vpop.eup %1613  ;;  %1482 = vmatprep.mubr.msk.bf16.mxu0 %vm1848_vm1, %v1847_v0  ;;  %1481 = vmatpush3.bf16.msra.mxu0 %v987_v34 }
 0x2b2   : > { %v711_v27 = vsel %vm418_vm0, %v1614_v25, 0.0  ;;  %v754_v28 = vpack.c.bf16 %v1614_v25, %v1614_v25  ;;  %v1616_v30 = vpop.eup %1615  ;;  %1486 = vmatprep.subr.bf16.mxu0 %v1847_v0 }
 0x2b3   : > { %712 = vadd.xlane.f32.xlu1 %v711_v27  ;;  %v1618_v31 = vpop.eup %1617  ;;  %v698_v41 = vmul.f32 %v1616_v30, %v694_v39  ;;  %v1085_v39 = vld [vmem:[#allocation11 + $0x8] sm:$0xf] }
 0x2b4   : > { %1477 = vmatmul.mubr.msk.bf16.vlgmr.msra.gmra.mrb[20].mxu1 %vm418_vm0, %v754_v28  ;;  %v1620_v32 = vpop.eup %1619  ;;  %v701_v51 = vmul.f32 %v1618_v31, %v697_v50  ;;  %v971_v28 = vld [vmem:[#allocation11] sm:$0xf] }
 0x2b5   : > { %v699_v37 = vmul.f32 %v1620_v32, %v695_v36  ;;  %v1622_v42 = vpop.eup %1621 }
 0x2b6   : > { %v700_v46 = vmul.f32 %v1622_v42, %v696_v44 }
 0x2bd   : > { %729 = vperm.xlu0 %1605, %v1616_v30   ;;  %v725_v30 = vld [vmem:[#allocation4 + $0x10] sm:$0xff] }
 0x2c1   : > { %744 = vperm.xlu0 %1605, %v1618_v31  }
 0x2c4   : > { %734 = vperm.xlu1 %1606, %v1620_v32   ;;  %v1033_v32 = vsel %vm758_vm4, %v971_v28, 0 }
 0x330   : > { %v707_v38 = vpop.xlane.xlu1 %706 }
 0x331   : > { %v715_v40 = vadd.f32 %v707_v38, %v699_v37 }
 0x333   : > { %720 = vst.msk [vmem:[#allocation3 + $0x8] sm:$0xff] %vm409_vm2, %v715_v40 }
 0x334   : > { %v704_v43 = vpop.xlane.xlu0 %703 }
 0x335   : > { %v714_v45 = vadd.f32 %v704_v43, %v698_v41  ;;  %v1090_v41 = vsel %vm758_vm4, %v1085_v39, 0 }
 0x337   : > { %719 = vst.msk [vmem:[#allocation3] sm:$0xff] %vm409_vm2, %v714_v45  ;;  %v1143_v45 = vld [vmem:[#allocation11 + $0xc] sm:$0xf] }
 0x338   : > { %v710_v47 = vpop.xlane.xlu1 %709 }
 0x339   : > { %v716_v48 = vadd.f32 %v710_v47, %v700_v46  ;;  %v1148_v47 = vsel %vm758_vm4, %v1143_v45, 0 }
 0x33a   : > { %v956_v49 = vld [vmem:[#allocation3 + $0x8] sm:$0xff] }
 0x33b   : > { %721 = vst.msk [vmem:[#allocation3 + $0x10] sm:$0xff] %vm409_vm2, %v716_v48  ;;  %1623 = vrcp.f32 %v956_v49 }
 0x33c   : > { %v730_v2 = vpop.permute.xlu0 %729 }
 0x33d   : > { %v747_v7 = vmul.f32 %v730_v2, %v723_v1 }
 0x33e   : > { %v955_v53 = vld [vmem:[#allocation3] sm:$0xff] }
 0x33f   : > { %1625 = vrcp.f32 %v955_v53 }
 0x340   : > { %v713_v52 = vpop.xlane.xlu1 %712  ;;  %v745_v15 = vpop.permute.xlu0 %744 }
 0x341   : > { %v717_v54 = vadd.f32 %v713_v52, %v701_v51  ;;  %v750_v19 = vmul.f32 %v745_v15, %v726_v14 }
 0x342   : > { %v957_v55 = vld [vmem:[#allocation3 + $0x10] sm:$0xff] }
 0x343   : > { %722 = vst.msk [vmem:[#allocation3 + $0x18] sm:$0xff] %vm409_vm2, %v717_v54  ;;  %1627 = vrcp.f32 %v957_v55 }
 0x344   : > { %v735_v62 = vpop.permute.xlu1 %734 }
 0x345   : > { %v1624_v56 = vpop.eup %1623  ;;  %v748_v63 = vmul.f32 %v735_v62, %v724_v61 }
 0x346   : > { %976 = vperm.xlu1 %1606, %v1624_v56  }
 0x349   : > { %v1626_v58 = vpop.eup %1625 }
 0x34a   : > { %739 = vperm.xlu1 %1606, %v1622_v42   ;;  %v958_v57 = vld [vmem:[#allocation3 + $0x18] sm:$0xff] }
 0x34b   : > { %1629 = vrcp.f32 %v958_v57 }
 0x34d   : > { %v1628_v59 = vpop.eup %1627 }
 0x34e   : > { %966 = vperm.xlu1 %1606, %v1626_v58  }
 0x352   : > { %1079 = vperm.xlu1 %1606, %v1628_v59  }
 0x355   : > { %v1630_v60 = vpop.eup %1629 }
 0x356   : > { %1137 = vperm.xlu0 %1605, %v1630_v60  }
 0x377   : > { %v842_v3 = vpop.f32.mrb[16].mxu1 }
 0x378   : > { %v941_v4 = vadd.f32 %v842_v3, %v748_v63  ;;  %v1466_v5 = vpop.f32.mrb[17].mxu1 }
 0x379   : > { %v845_v6 = vpop.f32.mrb[18].mxu1 }
 0x37a   : > { %945 = vst.msk [vmem:[#allocation4 + $0x8] sm:$0xff] %vm418_vm0, %v941_v4  ;;  %v1467_v8 = vpop.f32.mrb[19].mxu1 }
 0x37b   : > { %v796_v9 = vpop.f32.mrb[0].mxu0 }
 0x37c   : > { %v940_v10 = vadd.f32 %v796_v9, %v747_v7  ;;  %v1460_v11 = vpop.f32.mrb[1].mxu0 }
 0x37d   : > { %v799_v12 = vpop.f32.mrb[2].mxu0 }
 0x37e   : > { %944 = vst.msk [vmem:[#allocation4] sm:$0xff] %vm418_vm0, %v940_v10  ;;  %v1461_v13 = vpop.f32.mrb[3].mxu0 }
 0x381   : > { %v973_v26 = vld [vmem:[#allocation4 + $0x8] sm:$0xff] }
 0x383   : > { %v888_v16 = vpop.f32.mrb[4].mxu0 }
 0x384   : > { %v1472_v17 = vpop.f32.mrb[5].mxu0 }
 0x385   : > { %v891_v18 = vpop.f32.mrb[6].mxu0  ;;  %v963_v37 = vld [vmem:[#allocation4] sm:$0xff] }
 0x386   : > { %v1473_v20 = vpop.f32.mrb[7].mxu0 }
 0x387   : > { %v934_v21 = vpop.f32.mrb[20].mxu1 }
 0x388   : > { %v943_v22 = vadd.f32 %v934_v21, %v750_v19  ;;  %v1478_v23 = vpop.f32.mrb[21].mxu1 }
 0x389   : > { %v937_v24 = vpop.f32.mrb[22].mxu1 }
 0x38a   : > { %947 = vst.msk [vmem:[#allocation4 + $0x18] sm:$0xff] %vm418_vm0, %v943_v22  ;;  %v1479_v25 = vpop.f32.mrb[23].mxu1 }
 0x391   : > { %v1134_v49 = vld [vmem:[#allocation4 + $0x18] sm:$0xff] }
 0x3c5   : > { %v977_v27 = vpop.permute.xlu1 %976 }
 0x3c6   : > { %v979_v29 = vmul.f32 %v977_v27, %v973_v26 }
 0x3c8   : > { %v980_v31 = vpack.c.bf16 %v979_v29, %v979_v29 }
 0x3c9   : > { %v740_v33 = vpop.permute.xlu1 %739 }
 0x3ca   : > { %v749_v34 = vmul.f32 %v740_v33, %v725_v30  ;;  %1483 = vmatmul.mubr.msk.bf16.vlgmr.msra.gmra.mrb[8].mxu0 %vm418_vm0, %v980_v31 }
 0x3cb   : > { %1487 = vmatpush3.bf16.msra.mxu0 %v1033_v32  ;;  %1488 = vmatprep.mubr.msk.bf16.mxu0 %vm1848_vm1, %v1847_v0 }
 0x3cc   : > { %v942_v35 = vadd.f32 %v888_v16, %v749_v34  ;;  %1492 = vmatprep.subr.bf16.mxu0 %v1847_v0 }
 0x3cd   : > { %v967_v36 = vpop.permute.xlu1 %966 }
 0x3ce   : > { %946 = vst.msk [vmem:[#allocation4 + $0x10] sm:$0xff] %vm418_vm0, %v942_v35  ;;  %v969_v38 = vmul.f32 %v967_v36, %v963_v37 }
 0x3d0   : > { %v970_v40 = vpack.c.bf16 %v969_v38, %v969_v38 }
 0x3d1   : > { %v1080_v43 = vpop.permute.xlu1 %1079 }
 0x3d5   : > { %v1076_v42 = vld [vmem:[#allocation4 + $0x10] sm:$0xff]  ;;  %v1138_v48 = vpop.permute.xlu0 %1137 }
 0x3d6   : > { %1489 = vmatmul.mubr.msk.bf16.vlgmr.msra.gmra.mrb[8].mxu0 %vm418_vm0, %v970_v40  ;;  %v1082_v44 = vmul.f32 %v1080_v43, %v1076_v42  ;;  %v1140_v50 = vmul.f32 %v1138_v48, %v1134_v49 }
 0x3d7   : > { %1493 = vmatpush3.bf16.msra.mxu0 %v1090_v41  ;;  %1494 = vmatprep.mubr.msk.bf16.mxu0 %vm1848_vm1, %v1847_v0 }
 0x3d8   : > { %1498 = vmatprep.subr.bf16.mxu0 %v1847_v0  ;;  %v1083_v46 = vpack.c.bf16 %v1082_v44, %v1082_v44  ;;  %v1141_v51 = vpack.c.bf16 %v1140_v50, %v1140_v50 }
 0x3e2   : > { %1495 = vmatmul.mubr.msk.bf16.vlgmr.msra.gmra.mrb[8].mxu0 %vm418_vm0, %v1083_v46 }
 0x3e3   : > { %1499 = vmatpush3.bf16.msra.mxu0 %v1148_v47  ;;  %1500 = vmatprep.mubr.msk.bf16.mxu0 %vm1848_vm1, %v1847_v0 }
 0x3ee   : > { %1501 = vmatmul.mubr.msk.bf16.vlgmr.msra.gmra.mrb[8].mxu0 %vm418_vm0, %v1141_v51 }
 0x4c1   : > { %v1184_v52 = vpop.f32.mrb[8].mxu0 }
 0x4c2   : > { %v1191_v53 = vpack.c.bf16 %v1184_v52, %v1184_v52  ;;  %v1502_v54 = vpop.f32.mrb[9].mxu0 }
 0x4c3   : > { %v1187_v0 = vpop.f32.mrb[10].mxu0 }
 0x4c4   : > { %v1503_v55 = vpop.f32.mrb[11].mxu0  ;;  %1193 = vst.msk [vmem:[%s393_s23] sm:$0xf] %vm1192_vm5, %v1191_v53 }
 0x4c5   : > { %1762 = shalt.err (!%p1759_p3)
}
 0x4c6   : > { %s1763_s15 = scalar_lea.hbm %s2310_s0, 64  ;;  %s1767_s13 = scalar_lea.hbm %s2364_s5, 128 }
 0x4c7   : > { %p1764_p6 = scmp.ne.s32.totalorder %s2310_s0, %s1763_s15  ;;  %p1768_p12 = scmp.lt.u32.totalorder %s2310_s0, %s2364_s5 }
 0x4c8   : > { %p1769_p1 = scmp.lt.u32.totalorder %s1767_s13, %s1763_s15  ;;  %p1771_p13 = scmp.lt.u32.totalorder %s1763_s15, %s2310_s0 }
 0x4c9   : > { %p1765_p9 = pnand %p1764_p6, %p2411_p11 }
 0x4ca   : > { %p1770_p2 = por %p1769_p1, %p1768_p12 }
 0x4cb   : > { %p1766_p8 = pneg %p1765_p9 }
 0x4cc   : > { %p1772_p0 = por %p1771_p13, %p1770_p2 }
 0x4ce   : > { %p1773_p5 = pnand %p1772_p0, %p1766_p8 }
 0x4d0   : > { %1776 = shalt.err (!%p1773_p5)
}
 0x4d1   : > { %1526 = dma.vmem_to_hbm [thread:$0]  (%p2411_p11), %s2312_s24, 64, %s2310_s0, %s1195_s21  }
 0x4d2 PF: > { %s2412_s25 = sld [smem:[#allocation20_spill]]  ;;  %s1221_s8 = sand.u32 1, %s1819_s18  }
 0x4d3   : > { %p2413_p10 = scmp.ne.s32.totalorder %s2397_s12, 0  ;;  %s1222_s29 = scalar_lea.sflag [#allocation7], %s1221_s8 }
 0x4d8   : > { %p2414_p7 = scmp.ge.s32.totalorder %s2412_s25, 2 }
 0x4da   : > { %p1543_p4 = pnand %p2414_p7, %p2413_p10 }
 0x4dc   : > { %1814 = dma.done.wait (!%p1543_p4), %s1222_s29, 64  }
 0x4dd   : > { %1816 = vsyncadd (!%p1543_p4), %s1222_s29, 4294967232  ;;  %s25_s23 = sadd.s32 1, %s2412_s25   ;;  %s2415_s17 = sld [smem:[#allocation18_spill]] }
 0x4de   : > { %p22_p3 = scmp.ge.s32.totalorder %s25_s23, 4   ;;  %s2416_s20 = sld [smem:[#allocation22_spill]] }
 0x4df   : > { %s2417_s21 = sld [smem:[#allocation19_spill]]  ;;  %s2418_s22 = sld [smem:[#allocation21_spill]] }
 0x4e0   : > { %s2419_s18 = smov %s1823_s19  ;;  %24 = sbr.rel (!%p22_p3) target bundleno = 12 (0xc), region = 130 }
 0x4e3   : > { %s2420_s19 = smov %s2415_s17 }
 0x4e7   :  { %1227 = vsyncpa [#allocation6], 1 }
 0x4e8   :  { %1229 = vsyncpa [#allocation6 + $0x1], 1 }
 0x4e9   :  { %1230 = vsyncpa [#allocation9], 1 }
 0x4ea   :  { %1232 = vsyncpa [#allocation9 + $0x1], 1 }
 0x4eb   :  { %1233 = vsyncpa [#allocation12], 1 }
 0x4ec   :  { %1234 = vsyncpa [#allocation7], 1 }
 0x4ed   :  { %1236 = vsyncpa [#allocation7 + $0x1], 1 }

</bundles_post_ra>
